<compile_context>
chip_gen: v7x
topology: tpu7x:2x2x1
jax: 0.10.0
libtpu: 0.0.40
codegen_flags: <defaults>
</compile_context>

<pallas_src>
import jax
import jax.numpy as jnp
from jax.experimental import pallas as pl
from jax.experimental.pallas import tpu as pltpu


# ---------------------------------------------------------------------------
# Kernels
# ---------------------------------------------------------------------------
def _swiglu_partial(x_ref, w13t_ref, w2t_ref):
    """One grid step: fused gate/up matmul + SiLU-gate + partial W2 product (f32)."""
    ti = w2t_ref.shape[0]
    # Single long MXU push for gate+up: (tm, H) @ (H, 2*ti) -> (tm, 2*ti), f32 acc.
    h = jnp.dot(x_ref[...], w13t_ref[...], preferred_element_type=jnp.float32)
    h1 = h[:, :ti]            # lane-aligned split (ti is a multiple of 128,
    h3 = h[:, ti:]            # or the padded full width when n_k == 1)
    g = (h1 * jax.nn.sigmoid(h1)) * h3        # SiLU(h1) * h3, in f32
    # Partial contraction over this I-slice, f32 accumulation on the MXU.
    return jnp.dot(g.astype(w2t_ref.dtype), w2t_ref[...],
                   preferred_element_type=jnp.float32)


def _swiglu_kernel_f32_out(x_ref, w13t_ref, w2t_ref, o_ref):
    """f32 output: accumulate directly into the resident o_ref (no scratch)."""
    k = pl.program_id(1)

    @pl.when(k == 0)
    def _init():
        o_ref[...] = jnp.zeros_like(o_ref)

    o_ref[...] += _swiglu_partial(x_ref, w13t_ref, w2t_ref)


def _swiglu_kernel_acc(x_ref, w13t_ref, w2t_ref, o_ref, acc_ref):
    """Narrow output dtype (e.g. bf16): f32 VMEM accumulator, cast at the end."""
    k = pl.program_id(1)

    @pl.when(k == 0)
    def _init():
        acc_ref[...] = jnp.zeros_like(acc_ref)

    acc_ref[...] += _swiglu_partial(x_ref, w13t_ref, w2t_ref)

    @pl.when(k == pl.num_programs(1) - 1)
    def _finalize():
        o_ref[...] = acc_ref[...].astype(o_ref.dtype)


# ---------------------------------------------------------------------------
# Wrapper helpers
# ---------------------------------------------------------------------------
def _round_up(a: int, b: int) -> int:
    return (a + b - 1) // b * b


def _chip_info():
    """Best-effort (vmem_capacity_bytes, is_v7x-like, is_v5e-like)."""
    kind = ""
    try:
        kind = jax.devices()[0].device_kind.lower()
    except Exception:
        pass
    vmem_cap = 128 << 20
    try:
        vmem_cap = int(pltpu.get_tpu_info().vmem_capacity_bytes)
    except Exception:
        pass
    is_v7 = ("v7" in kind) or vmem_cap <= (64 << 20)
    is_v5e = ("v5e" in kind) or ("v5 lite" in kind) or ("v5lite" in kind)
    return vmem_cap, is_v7, is_v5e


def prepare_swiglu_weights(w1, w2, w3, *, ti=None):
    """One-time weight prep (keep OUT of the per-call hot path).

    Inputs (PyTorch nn.Linear layout, bias=False):
      w1, w3: (I, H);  w2: (H, I)
    Returns (w13t, w2t, ti):
      w13t: (H, 2*I_pad) -- per-ti-tile interleaved [w1^T tile_k | w3^T tile_k]
      w2t : (I_pad, H)   -- W2^T with zero-padded rows
      ti  : lane-aligned reduction tile; I_pad = n_k * ti (zero padding is
            mathematically inert: padded gate cols give SiLU(0)*0 = 0).
    """
    w1 = jnp.asarray(w1)
    w2 = jnp.asarray(w2)
    w3 = jnp.asarray(w3)
    I, H = w1.shape
    assert w3.shape == (I, H) and w2.shape == (H, I)

    if ti is None:
        _, _, is_v5e = _chip_info()
        ti = 512 if is_v5e else 256
    ti = max(128, (int(ti) // 128) * 128)

    I_pad = _round_up(I, 128)
    if I_pad <= ti:
        ti = I_pad
    else:
        I_pad = _round_up(I_pad, ti)
    n_k = I_pad // ti
    pad_i = I_pad - I

    w1t = jnp.pad(w1.T, ((0, 0), (0, pad_i)))      # (H, I_pad)
    w3t = jnp.pad(w3.T, ((0, 0), (0, pad_i)))      # (H, I_pad)
    # Tile-interleave so grid step k sees the contiguous (H, 2*ti) block
    # [w1^T slice_k | w3^T slice_k] -> one fused MXU matmul per step.
    w13t = jnp.stack([w1t.reshape(H, n_k, ti), w3t.reshape(H, n_k, ti)], axis=2)
    w13t = w13t.reshape(H, 2 * I_pad)
    w2t = jnp.pad(w2.T, ((0, pad_i), (0, 0)))      # (I_pad, H)
    return w13t, w2t, ti


def swiglu_pallas_prepared(x, w13t, w2t, ti, *, tm=None, vmem_limit_bytes=None):
    """SwiGLU with pre-fused/transposed weights. x: (..., H)."""
    orig_shape = x.shape
    H = orig_shape[-1]
    I_pad = w2t.shape[0]
    assert w2t.shape == (I_pad, H)
    assert w13t.shape == (H, 2 * I_pad)
    assert I_pad % ti == 0
    n_k = I_pad // ti

    x2d = x.reshape(-1, H)
    M = x2d.shape[0]

    vmem_cap, is_v7, is_v5e = _chip_info()
    # Headroom below physical per-core VMEM: v7x 64 MiB -> ~56 MiB budget,
    # v5e/v6e 128 MiB -> ~112 MiB budget.
    budget = vmem_cap - max(8 << 20, vmem_cap // 8)

    x_item = jnp.dtype(x.dtype).itemsize
    w_item = jnp.dtype(w13t.dtype).itemsize
    sub = 8 if x_item >= 4 else (16 if x_item == 2 else 32)
    f32_out = jnp.dtype(x.dtype) == jnp.dtype(jnp.float32)

    # Row tile: per-step weight bytes are fixed, flops scale with tm, so pick
    # tm above the chip's compute/bandwidth break-even (v6e ~650 bf16 fl/B,
    # v7x ~310, v5e ~240).
    if tm is None:
        tm = 256 if is_v5e else (512 if is_v7 else 768)

    def vmem_est(tm_):
        return (2 * tm_ * H * x_item                 # x, double buffered
                + 2 * tm_ * H * x_item               # out, double buffered
                + 2 * (H * 2 * ti) * w_item          # fused gate/up slice, 2-buf
                + 2 * (ti * H) * w_item              # w2^T slice, 2-buf
                + (0 if f32_out else tm_ * H * 4))   # f32 accumulator scratch

    tm = max(sub, min(int(tm), _round_up(M, sub)))
    tm = _round_up(tm, sub)
    while vmem_est(tm) > budget and tm > sub:        # fit the per-TC VMEM budget
        tm = max(sub, _round_up(tm // 2, sub))

    M_pad = _round_up(M, tm)

    # v7x: two TensorCores share the "parallel" M axis -> want >= 2 row tiles.
    if is_v7 and M > sub:
        while M_pad // tm < 2 and tm > sub:
            tm = max(sub, _round_up(tm // 2, sub))
            M_pad = _round_up(M, tm)

    if M_pad != M:
        x2d = jnp.pad(x2d, ((0, M_pad - M), (0, 0)))

    grid = (M_pad // tm, n_k)

    if vmem_limit_bytes is None:
        vmem_limit_bytes = max(32 << 20, int(1.25 * vmem_est(tm)) + (4 << 20))
        vmem_limit_bytes = int(min(vmem_limit_bytes, budget))

    cost = pl.CostEstimate(
        flops=6 * M_pad * H * I_pad,                 # three M*H*I matmuls
        transcendentals=M_pad * I_pad,               # one sigmoid per interm. elem
        # Weights are re-streamed once per M row-tile; x/out stream once each.
        bytes_accessed=(M_pad // tm) * 3 * H * I_pad * w_item
                       + 2 * M_pad * H * x_item,
    )

    if f32_out:
        kernel = _swiglu_kernel_f32_out
        scratch = []
    else:
        kernel = _swiglu_kernel_acc
        scratch = [pltpu.VMEM((tm, H), jnp.float32)]

    out2d = pl.pallas_call(
        kernel,
        out_shape=jax.ShapeDtypeStruct((M_pad, H), x.dtype),
        grid_spec=pltpu.PrefetchScalarGridSpec(
            num_scalar_prefetch=0,
            grid=grid,
            in_specs=[
                pl.BlockSpec((tm, H), lambda i, k: (i, 0)),       # x rows (const over k)
                pl.BlockSpec((H, 2 * ti), lambda i, k: (0, k)),   # fused [w1^T|w3^T] slice
                pl.BlockSpec((ti, H), lambda i, k: (k, 0)),       # w2^T slice
            ],
            out_specs=pl.BlockSpec((tm, H), lambda i, k: (i, 0)),
            scratch_shapes=scratch,
        ),
        compiler_params=pltpu.CompilerParams(
            dimension_semantics=("parallel", "arbitrary"),
            vmem_limit_bytes=vmem_limit_bytes,
        ),
        cost_estimate=cost,
    )(x2d, w13t, w2t)

    if M_pad != M:
        out2d = out2d[:M]
    return out2d.reshape(orig_shape)


def swiglu_pallas(x, w1, w2, w3, *, tm=None, ti=None):
    """Convenience wrapper taking PyTorch-layout weights (preps per call).

    Prefer prepare_swiglu_weights() once + swiglu_pallas_prepared() in real use.
    """
    w13t, w2t, ti = prepare_swiglu_weights(w1, w2, w3, ti=ti)
    return swiglu_pallas_prepared(x, w13t, w2t, ti, tm=tm)


def swiglu_ref(x, w1, w2, w3):
    h1 = x @ w1.T
    h3 = x @ w3.T
    g = (h1 * jax.nn.sigmoid(h1)) * h3
    return g @ w2.T


if __name__ == "__main__":
    batch, seq, hidden, intermediate = 2, 8, 32, 64

    key = jax.random.PRNGKey(0)
    kx, k1, k2, k3 = jax.random.split(key, 4)

    x = jax.random.normal(kx, (batch, seq, hidden), dtype=jnp.float32)
    # PyTorch nn.Linear weight layout (out_features, in_features).
    w1 = jax.random.normal(k1, (intermediate, hidden), dtype=jnp.float32) * (hidden ** -0.5)
    w2 = jax.random.normal(k2, (hidden, intermediate), dtype=jnp.float32) * (intermediate ** -0.5)
    w3 = jax.random.normal(k3, (intermediate, hidden), dtype=jnp.float32) * (hidden ** -0.5)

    # Prepare (fuse/transpose/pad) weights once, outside the hot path.
    w13t, w2t, ti = prepare_swiglu_weights(w1, w2, w3)

    out = swiglu_pallas_prepared(x, w13t, w2t, ti)
    out = jax.block_until_ready(out)

    ref = swiglu_ref(x, w1, w2, w3)
    assert out.shape == (batch, seq, hidden)
    assert jnp.allclose(out, ref, atol=1e-4, rtol=1e-4), "mismatch vs reference"

    print("KERNEL_OK")
</pallas_src>

<mosaic_0001>
module attributes {stable_mosaic.version = 11 : i64} {
  func.func @_swiglu_kernel_f32_out(%arg0: i32, %arg1: i32, %arg2: memref<16x32xf32, #tpu.memory_space<vmem>>, %arg3: memref<32x256xf32, #tpu.memory_space<vmem>>, %arg4: memref<128x32xf32, #tpu.memory_space<vmem>>, %arg5: memref<16x32xf32, #tpu.memory_space<vmem>>) attributes {dimension_semantics = [#tpu.dimension_semantics<parallel>, #tpu.dimension_semantics<arbitrary>], iteration_bounds = array<i64: 1, 1>, scalar_prefetch = 0 : i64, scratch_operands = 0 : i64, tpu.core_type = #tpu.core_type<tc>, window_params = [{transform_indices = @transform_0, window_bounds = array<i64: 16, 32>}, {transform_indices = @transform_1, window_bounds = array<i64: 32, 256>}, {transform_indices = @transform_2, window_bounds = array<i64: 128, 32>}, {transform_indices = @transform_3, window_bounds = array<i64: 16, 32>}]} {
    %c0_i32 = arith.constant 0 : i32
    %0 = arith.cmpi eq, %arg1, %c0_i32 : i32
    %1 = arith.extui %0 : i1 to i32
    %c0_i32_0 = arith.constant 0 : i32
    %2 = arith.cmpi ne, %1, %c0_i32_0 : i32
    scf.if %2 {
      %cst_12 = arith.constant 0.000000e+00 : f32
      %20 = vector.broadcast %cst_12 : f32 to vector<16x32xf32>
      %c0_13 = arith.constant 0 : index
      %c0_14 = arith.constant 0 : index
      %21 = vector.load %arg5[%c0_13, %c0_14] : memref<16x32xf32, #tpu.memory_space<vmem>>, vector<16x32xf32>
      tpu.vector_store %arg5[%c0_13, %c0_14], %20 {strides = array<i32>} : memref<16x32xf32, #tpu.memory_space<vmem>>, vector<16x32xf32>,
    } else {
    }
    %c0 = arith.constant 0 : index
    %c0_1 = arith.constant 0 : index
    %3 = vector.load %arg5[%c0, %c0_1] : memref<16x32xf32, #tpu.memory_space<vmem>>, vector<16x32xf32>
    %c0_2 = arith.constant 0 : index
    %c0_3 = arith.constant 0 : index
    %4 = vector.load %arg2[%c0_2, %c0_3] : memref<16x32xf32, #tpu.memory_space<vmem>>, vector<16x32xf32>
    %c0_4 = arith.constant 0 : index
    %c0_5 = arith.constant 0 : index
    %5 = vector.load %arg3[%c0_4, %c0_5] : memref<32x256xf32, #tpu.memory_space<vmem>>, vector<32x256xf32>
    %cst = arith.constant dense<0.000000e+00> : vector<16x256xf32>
    %6 = tpu.matmul %4, %5, %cst {dimension_numbers = #tpu.dot_dimension_numbers<[1], [0], [0], [1], [0, 0, 1, 1], [], []>} : vector<16x32xf32>, vector<32x256xf32>, vector<16x256xf32> -> vector<16x256xf32>
    %7 = vector.extract_strided_slice %6 {offsets = [0, 0], sizes = [16, 128], strides = [1, 1]} : vector<16x256xf32> to vector<16x128xf32>
    %8 = vector.extract_strided_slice %6 {offsets = [0, 128], sizes = [16, 128], strides = [1, 1]} : vector<16x256xf32> to vector<16x128xf32>
    %9 = arith.negf %7 : vector<16x128xf32>
    %10 = math.exp %9 : vector<16x128xf32>
    %cst_6 = arith.constant 1.000000e+00 : f32
    %11 = vector.broadcast %cst_6 : f32 to vector<16x128xf32>
    %12 = arith.addf %11, %10 : vector<16x128xf32>
    %13 = arith.divf %11, %12 : vector<16x128xf32>
    %14 = arith.mulf %7, %13 : vector<16x128xf32>
    %15 = arith.mulf %14, %8 : vector<16x128xf32>
    %c0_7 = arith.constant 0 : index
    %c0_8 = arith.constant 0 : index
    %16 = vector.load %arg4[%c0_7, %c0_8] : memref<128x32xf32, #tpu.memory_space<vmem>>, vector<128x32xf32>
    %cst_9 = arith.constant dense<0.000000e+00> : vector<16x32xf32>
    %17 = tpu.matmul %15, %16, %cst_9 {dimension_numbers = #tpu.dot_dimension_numbers<[1], [0], [0], [1], [0, 0, 1, 1], [], []>} : vector<16x128xf32>, vector<128x32xf32>, vector<16x32xf32> -> vector<16x32xf32>
    %18 = arith.addf %3, %17 : vector<16x32xf32>
    %c0_10 = arith.constant 0 : index
    %c0_11 = arith.constant 0 : index
    %19 = vector.load %arg5[%c0_10, %c0_11] : memref<16x32xf32, #tpu.memory_space<vmem>>, vector<16x32xf32>
    tpu.vector_store %arg5[%c0_10, %c0_11], %18 {strides = array<i32>} : memref<16x32xf32, #tpu.memory_space<vmem>>, vector<16x32xf32>,
    return
  }
  func.func @transform_0(%arg0: i32, %arg1: i32) -> (i32, i32) {
    %c0_i32 = arith.constant 0 : i32
    %c0_i32_0 = arith.constant 0 : i32
    return %arg0, %c0_i32 : i32, i32
  }
  func.func @transform_1(%arg0: i32, %arg1: i32) -> (i32, i32) {
    %c0_i32 = arith.constant 0 : i32
    %c0_i32_0 = arith.constant 0 : i32
    return %c0_i32, %arg1 : i32, i32
  }
  func.func @transform_2(%arg0: i32, %arg1: i32) -> (i32, i32) {
    %c0_i32 = arith.constant 0 : i32
    %c0_i32_0 = arith.constant 0 : i32
    return %arg1, %c0_i32 : i32, i32
  }
  func.func @transform_3(%arg0: i32, %arg1: i32) -> (i32, i32) {
    %c0_i32 = arith.constant 0 : i32
    %c0_i32_0 = arith.constant 0 : i32
    return %arg0, %c0_i32 : i32, i32
  }
}

</mosaic_0001>

<bundles_post_ra>
// kernel: tpu_custom_call.1
= control target key start
LH: loop header
LB: loop body
LE: loop exit
PB: predicated region body
PF: predicated region fallthrough
CT: control target
= control target key end

     0   :  { %vm19_vm0 = vcmask 261120   ;;  %v378_v7 = vmov 0.0   ;;  %s498_s0 = inlined_call_operand.vmem [shape: f32[16,32], index: 0, kind: input, shape index: {}]   ;;  %s499_s1 = inlined_call_operand.vmem [shape: f32[32,256], index: 1, kind: input, shape index: {}]   ;;  %s500_s2 = inlined_call_operand.vmem [shape: f32[128,32], index: 2, kind: input, shape index: {}]   ;;  %s501_s3 = inlined_call_operand.hbm [shape: f32[16,32], index: 3, kind: output, shape index: {}]  }
   0x1   :  { %v27_v0 = vld [vmem:[%s499_s1 + $0x8] sm:$0xff]  ;;  %v29_v1 = vld [vmem:[%s499_s1 + $0x18] sm:$0xff]  ;;  %v26_v2 = vld [vmem:[%s499_s1] sm:$0xff]  ;;  %20 = vst.msk [vmem:[#allocation2] sm:$0xff] %vm19_vm0, %v378_v7  ;;  %105 = vmatprep.mubr.f32.mxu0 %v378_v7 }
   0x2   :  { %v302_v3 = vpack.c.bf16 %v29_v1, %v27_v0  ;;  %v28_v4 = vld [vmem:[%s499_s1 + $0x10] sm:$0xff]  ;;  %v31_v5 = vld [vmem:[%s499_s1 + $0x28] sm:$0xff]  ;;  %v33_v6 = vld [vmem:[%s499_s1 + $0x38] sm:$0xff]  ;;  %21 = vst.msk [vmem:[#allocation2 + $0x8] sm:$0xff] %vm19_vm0, %v378_v7 }
   0x3   :  { %v304_v8 = vpack.c.bf16 %v28_v4, %v26_v2  ;;  %v306_v9 = vpack.c.bf16 %v33_v6, %v31_v5  ;;  %v30_v10 = vld [vmem:[%s499_s1 + $0x20] sm:$0xff]  ;;  %v32_v11 = vld [vmem:[%s499_s1 + $0x30] sm:$0xff] }
   0x4   :  { %303 = vmatprep.subr.bf16.mxu0 %v302_v3 }
   0x5   :  { %8 = vsyncpa [#allocation3], 0  ;;  %305 = vmatpush1.bf16.msra.mxu0 %v304_v8  ;;  %v308_v12 = vpack.c.bf16 %v32_v11, %v30_v10  ;;  %v24_v13 = vld [vmem:[%s498_s0] sm:$0xff]  ;;  %v25_v14 = vld [vmem:[%s498_s0 + $0x8] sm:$0xff] }
   0x6   :  { %307 = vmatprep.subr.bf16.mxu0 %v306_v9  ;;  %v134_v15 = vld [vmem:[%s500_s2] sm:$0xff]  ;;  %v135_v16 = vld [vmem:[%s500_s2 + $0x8] sm:$0xff]  ;;  %v136_v18 = vld [vmem:[%s500_s2 + $0x10] sm:$0xff] }
   0x7   :  { %v310_v17 = vpack.c.bf16 %v135_v16, %v134_v15  ;;  %v137_v19 = vld [vmem:[%s500_s2 + $0x18] sm:$0xff]  ;;  %v138_v21 = vld [vmem:[%s500_s2 + $0x20] sm:$0xff]  ;;  %v139_v22 = vld [vmem:[%s500_s2 + $0x28] sm:$0xff] }
   0x8   :  { %v314_v20 = vpack.c.bf16 %v137_v19, %v136_v18  ;;  %v318_v23 = vpack.c.bf16 %v139_v22, %v138_v21  ;;  %v140_v24 = vld [vmem:[%s500_s2 + $0x30] sm:$0xff]  ;;  %v141_v25 = vld [vmem:[%s500_s2 + $0x38] sm:$0xff]  ;;  %v142_v27 = vld [vmem:[%s500_s2 + $0x40] sm:$0xff] }
   0x9   :  { %309 = vmatpush1.bf16.msra.mxu0 %v308_v12  ;;  %311 = vmatprep.subr.bf16.mxu1 %v310_v17  ;;  %v322_v26 = vpack.c.bf16 %v141_v25, %v140_v24  ;;  %v143_v28 = vld [vmem:[%s500_s2 + $0x48] sm:$0xff]  ;;  %v144_v30 = vld [vmem:[%s500_s2 + $0x50] sm:$0xff]  ;;  %v145_v31 = vld [vmem:[%s500_s2 + $0x58] sm:$0xff] }
   0xa   :  { %313 = vmatpush3.bf16.msra.mxu1 %v310_v17  ;;  %v326_v29 = vpack.c.bf16 %v143_v28, %v142_v27  ;;  %v330_v32 = vpack.c.bf16 %v145_v31, %v144_v30  ;;  %v146_v33 = vld [vmem:[%s500_s2 + $0x60] sm:$0xff]  ;;  %v147_v34 = vld [vmem:[%s500_s2 + $0x68] sm:$0xff]  ;;  %v148_v36 = vld [vmem:[%s500_s2 + $0x70] sm:$0xff] }
   0xb   :  { %315 = vmatprep.subr.bf16.mxu1 %v314_v20  ;;  %v334_v35 = vpack.c.bf16 %v147_v34, %v146_v33  ;;  %v149_v37 = vld [vmem:[%s500_s2 + $0x78] sm:$0xff]  ;;  %v23_v55 = vld [vmem:[#allocation2 + $0x8] sm:$0xff]  ;;  %s379_s2 = smov [#allocation2]   ;;  %v22_v56 = vld [vmem:[#allocation2] sm:$0xff] }
   0xc   :  { %245 = vmatmul.mubr.msk.f32.vlgmr.msra.gmra.mrb[0].mxu0 %vm19_vm0, %v24_v13  ;;  %v338_v38 = vpack.c.bf16 %v149_v37, %v148_v36  ;;  %s234_s7 = sshll.u32 %s379_s2, 4  ;;  %s235_s7 = int_to_ptr.vmem [resolvable:$true] %s234_s7 }
   0xd   :  { %111 = vmatprep.mubr.f32.mxu0 %v378_v7  ;;  %s354_s8 = scalar_lea.vmem %s235_s7, 256  ;;  %p359_p1 = scmp.lt.s32.totalorder %s235_s7, %s235_s7 }
   0xe   :  { %317 = vmatpush3.bf16.msra.mxu1 %v314_v20  ;;  %p355_p0 = scmp.ne.s32.totalorder %s235_s7, %s354_s8  ;;  %p360_p2 = scmp.lt.s32.totalorder %s354_s8, %s354_s8 }
   0xf   :  { %319 = vmatprep.subr.bf16.mxu1 %v318_v23 }
  0x10   :  { %246 = vmatmul.mubr.msk.f32.gmra.mrb[2].mxu0 %vm19_vm0, %v25_v14  ;;  %p361_p3 = por %p360_p2, %p359_p1 }
  0x12   :  { %321 = vmatpush3.bf16.msra.mxu1 %v318_v23  ;;  %p362_p4 = pnand %p361_p3, %p355_p0 }
  0x13   :  { %323 = vmatprep.subr.bf16.mxu1 %v322_v26 }
  0x16   :  { %325 = vmatpush3.bf16.msra.mxu1 %v322_v26 }
  0x17   :  { %327 = vmatprep.subr.bf16.mxu1 %v326_v29 }
  0x1a   :  { %329 = vmatpush3.bf16.msra.mxu1 %v326_v29 }
  0x1b   :  { %331 = vmatprep.subr.bf16.mxu1 %v330_v32 }
  0x1e   :  { %333 = vmatpush3.bf16.msra.mxu1 %v330_v32 }
  0x1f   :  { %335 = vmatprep.subr.bf16.mxu1 %v334_v35 }
  0x22   :  { %337 = vmatpush3.bf16.msra.mxu1 %v334_v35 }
  0x23   :  { %339 = vmatprep.subr.bf16.mxu1 %v338_v38 }
  0x26   :  { %341 = vmatpush3.bf16.msra.mxu1 %v338_v38 }
  0xdf   :  { %v107_v39 = vpop.f32.mrb[0].mxu0 }
  0xe0   :  { %v247_v40 = vmul.f32 -1.442695, %v107_v39  ;;  %v109_v41 = vpop.f32.mrb[1].mxu0 }
  0xe2   :  { %346 = vpow2.f32 %v247_v40 }
  0xe3   :  { %v113_v42 = vpop.f32.mrb[2].mxu0 }
  0xe4   :  { %v248_v43 = vmul.f32 -1.442695, %v113_v42  ;;  %v115_v44 = vpop.f32.mrb[3].mxu0 }
  0xe6   :  { %348 = vpow2.f32 %v248_v43 }
  0xec   :  { %v347_v45 = vpop.eup %346 }
  0xed   :  { %v124_v46 = vadd.f32 1.0, %v347_v45 }
  0xef   :  { %350 = vrcp.f32 %v124_v46 }
  0xf0   :  { %v349_v47 = vpop.eup %348 }
  0xf1   :  { %v125_v48 = vadd.f32 1.0, %v349_v47 }
  0xf3   :  { %352 = vrcp.f32 %v125_v48 }
  0xf9   :  { %v351_v49 = vpop.eup %350 }
  0xfa   :  { %v130_v50 = vmul.f32 %v351_v49, %v107_v39 }
  0xfc   :  { %v132_v51 = vmul.f32 %v130_v50, %v109_v41 }
  0xfd   :  { %v353_v52 = vpop.eup %352 }
  0xfe   :  { %v131_v53 = vmul.f32 %v353_v52, %v113_v42  ;;  %299 = vmatprep.mubr.f32.mxu1 %v132_v51 }
 0x100   :  { %v133_v54 = vmul.f32 %v131_v53, %v115_v44 }
 0x102   :  { %300 = vmatmul.mubr.f32.vlgmr.msra.gmra.mrb[0].mxu1 %v133_v54 }
 0x1d5   :  { %v301_v57 = vpop.f32.mrb[0].mxu1 }
 0x1d6   :  { %v226_v58 = vadd.f32 %v301_v57, %v23_v55  ;;  %v216_v59 = vpop.f32.mrb[1].mxu1 }
 0x1d7   :  { %v225_v60 = vadd.f32 %v216_v59, %v22_v56 }
 0x1d8   :  { %228 = vst.msk [vmem:[#allocation2 + $0x8] sm:$0xff] %vm19_vm0, %v226_v58 }
 0x1d9   :  { %227 = vst.msk [vmem:[#allocation2] sm:$0xff] %vm19_vm0, %v225_v60 }
 0x1da   :  { %365 = shalt.err (!%p362_p4)
}
 0x1db   :  { %s366_s11 = scalar_lea.hbm %s501_s3, 256 }
 0x1dc   :  { %p367_p5 = scmp.ne.s32.totalorder %s501_s3, %s366_s11  ;;  %p370_p6 = scmp.lt.u32.totalorder %s366_s11, %s501_s3 }
 0x1de   :  { %p372_p7 = pnand %p370_p6, %p367_p5 }
 0x1e0   :  { %375 = shalt.err (!%p372_p7)
}
 0x1e1   :  { %s380_s15 = smov 128   ;;  %s381_s16 = smov 8  }
 0x1e2   :  { %240 = dma.vmem_to_hbm [thread:$0]  %s235_s7, 256, %s501_s3, [#allocation3], %s380_s15, %s380_s15, %s381_s16  }
 0x1e3   :  { %376 = dma.done.wait [#allocation3], 256  }
 0x1e4   :  { %377 = vsyncadd [#allocation3], 4294967040 }
 0x1e5   :  { %244 = vsyncpa [#allocation3], 1 }

</bundles_post_ra>
